<compile_context>
chip_gen: v6e
topology: v6e:2x2x1
jax: 0.10.0
libtpu: 0.0.40
codegen_flags: <defaults>
</compile_context>

<pallas_src>
import jax
import jax.numpy as jnp
import numpy as np
from jax.experimental import pallas as pl
from jax.experimental.pallas import tpu as pltpu

# --- module-consistent hyperparameters ---------------------------------------
D_MODEL = 32
NHEAD = 4
HEAD_DIM = D_MODEL // NHEAD
DIM_FF = 64
SEQ = 8
BATCH = 2
EPS = 1e-5   # layer_norm_eps


def _layer_norm(x, gamma, beta):
    mu = jnp.mean(x, axis=-1, keepdims=True)
    var = jnp.mean((x - mu) ** 2, axis=-1, keepdims=True)
    return (x - mu) * jax.lax.rsqrt(var + EPS) * gamma + beta


def encoder_layer_kernel(x_ref,
                         wqkv_ref, bqkv_ref, wo_ref, vec_ref,
                         w1_ref, b1_ref, w2_ref,
                         o_ref):
    x = x_ref[...]                                   # (B*S, D), rows = (b, s)

    # packed small vectors: rows = [bo, g1, be1, g2, be2, b2]
    bo  = vec_ref[0:1, :]
    g1  = vec_ref[1:2, :]
    be1 = vec_ref[2:3, :]
    g2  = vec_ref[3:4, :]
    be2 = vec_ref[4:5, :]
    b2  = vec_ref[5:6, :]

    # ---- self-attention block (pre-norm): x + SA(LN1(x)) --------------------
    xn = _layer_norm(x, g1, be1)

    # ONE wide fused QKV matmul: (16,32) @ (32,96) -> (16,96)
    # (scale 1/sqrt(Hd) is pre-folded into the q columns of wqkv / bqkv)
    qkv = jnp.dot(xn, wqkv_ref[...],
                  preferred_element_type=jnp.float32) + bqkv_ref[...]

    # build (B*H, S, Hd) head batches with static slices (no transposes)
    def gather_heads(col_off):
        tiles = []
        for b in range(BATCH):
            for h in range(NHEAD):
                tiles.append(
                    qkv[b * SEQ:(b + 1) * SEQ,
                        col_off + h * HEAD_DIM: col_off + (h + 1) * HEAD_DIM][None])
        return jnp.concatenate(tiles, axis=0)        # (B*H, S, Hd)

    q = gather_heads(0)
    k = gather_heads(D_MODEL)
    v = gather_heads(2 * D_MODEL)

    # batched scores + ONE softmax for all (batch, head) pairs
    s = jnp.einsum("nqd,nkd->nqk", q, k,
                   preferred_element_type=jnp.float32)          # (B*H, S, S)
    s = s - jnp.max(s, axis=-1, keepdims=True)
    p = jnp.exp(s)
    p = p / jnp.sum(p, axis=-1, keepdims=True)                  # exact softmax
    ctx = jnp.einsum("nqk,nkd->nqd", p, v,
                     preferred_element_type=jnp.float32)        # (B*H, S, Hd)

    # merge heads back to (B*S, D): static slices + concats (XLU filler)
    ctx2d = jnp.concatenate(
        [jnp.concatenate([ctx[b * NHEAD + h] for h in range(NHEAD)], axis=-1)
         for b in range(BATCH)], axis=0)                        # (B*S, D)

    # single out-projection matmul: (16,32)@(32,32)
    attn = jnp.dot(ctx2d, wo_ref[...],
                   preferred_element_type=jnp.float32) + bo
    x1 = x + attn                                    # dropout1 == identity

    # ---- feed-forward block (pre-norm): x1 + FF(LN2(x1)) --------------------
    xn2 = _layer_norm(x1, g2, be2)
    hid = jnp.dot(xn2, w1_ref[...],
                  preferred_element_type=jnp.float32) + b1_ref[...]   # (16,64)
    hid = jnp.maximum(hid, 0.0)                      # relu; dropout == identity
    ff = jnp.dot(hid, w2_ref[...],
                 preferred_element_type=jnp.float32) + b2             # (16,32)
    o_ref[...] = (x1 + ff).astype(o_ref.dtype)       # dropout2 == identity


def pack_params(p):
    """Host-side (free) re-layout: transpose, fold scale, pack biases/vectors."""
    scale = 1.0 / (HEAD_DIM ** 0.5)
    w_qkv = jnp.concatenate([p["wq"].T * scale, p["wk"].T, p["wv"].T],
                            axis=1)                               # (D, 3D)
    b_qkv = jnp.concatenate([p["bq"] * scale, p["bk"], p["bv"]],
                            axis=1)                               # (1, 3D)
    wo_t = p["wo"].T                                              # (D, D)
    vecs = jnp.concatenate([p["bo"], p["g1"], p["be1"],
                            p["g2"], p["be2"], p["b2"]], axis=0)  # (6, D)
    return (w_qkv, b_qkv, wo_t, vecs, p["w1"].T, p["b1"], p["w2"].T)


def transformer_encoder_layer(src, params):
    """src: (S, B, D) float32 (PyTorch batch_first=False convention)."""
    S, B, D = src.shape
    x2d = jnp.transpose(src, (1, 0, 2)).reshape(B * S, D)   # rows ordered (b, s)
    packed = pack_params(params)

    vmem_spec = pl.BlockSpec(memory_space=pltpu.MemorySpace.VMEM)
    out2d = pl.pallas_call(
        encoder_layer_kernel,
        out_shape=jax.ShapeDtypeStruct((B * S, D), src.dtype),
        in_specs=[vmem_spec] * (1 + len(packed)),
        out_specs=vmem_spec,
    )(x2d, *packed)

    return jnp.transpose(out2d.reshape(B, S, D), (1, 0, 2))  # back to (S, B, D)


# ---- pure-JAX reference (same math) for a correctness check -----------------
def reference(src, p):
    x = jnp.transpose(src, (1, 0, 2))            # (B, S, D)

    def ln(v, g, b):
        mu = jnp.mean(v, -1, keepdims=True)
        var = jnp.mean((v - mu) ** 2, -1, keepdims=True)
        return (v - mu) / jnp.sqrt(var + EPS) * g + b

    xn = ln(x, p["g1"], p["be1"])
    q = xn @ p["wq"].T + p["bq"]
    k = xn @ p["wk"].T + p["bk"]
    v = xn @ p["wv"].T + p["bv"]
    B, S, D = x.shape
    qh = q.reshape(B, S, NHEAD, HEAD_DIM).transpose(0, 2, 1, 3)
    kh = k.reshape(B, S, NHEAD, HEAD_DIM).transpose(0, 2, 1, 3)
    vh = v.reshape(B, S, NHEAD, HEAD_DIM).transpose(0, 2, 1, 3)
    s = jnp.einsum("bhqd,bhkd->bhqk", qh, kh) / (HEAD_DIM ** 0.5)
    pmat = jax.nn.softmax(s, axis=-1)
    o = jnp.einsum("bhqk,bhkd->bhqd", pmat, vh).transpose(0, 2, 1, 3).reshape(B, S, D)
    o = o @ p["wo"].T + p["bo"]
    x1 = x + o
    xn2 = ln(x1, p["g2"], p["be2"])
    ff = jnp.maximum(xn2 @ p["w1"].T + p["b1"], 0.0) @ p["w2"].T + p["b2"]
    out = x1 + ff
    return jnp.transpose(out, (1, 0, 2))


def make_params(key):
    ks = jax.random.split(key, 12)
    f32 = jnp.float32
    return {
        # nn.MultiheadAttention: in_proj_weight (3D, D) split into q/k/v, out_proj (D, D)
        "wq": 0.1 * jax.random.normal(ks[0], (D_MODEL, D_MODEL), f32),
        "wk": 0.1 * jax.random.normal(ks[1], (D_MODEL, D_MODEL), f32),
        "wv": 0.1 * jax.random.normal(ks[2], (D_MODEL, D_MODEL), f32),
        "bq": 0.1 * jax.random.normal(ks[3], (1, D_MODEL), f32),
        "bk": 0.1 * jax.random.normal(ks[4], (1, D_MODEL), f32),
        "bv": 0.1 * jax.random.normal(ks[5], (1, D_MODEL), f32),
        "wo": 0.1 * jax.random.normal(ks[6], (D_MODEL, D_MODEL), f32),
        "bo": 0.1 * jax.random.normal(ks[7], (1, D_MODEL), f32),
        # LayerNorm params
        "g1": jnp.ones((1, D_MODEL), f32),
        "be1": jnp.zeros((1, D_MODEL), f32),
        "g2": jnp.ones((1, D_MODEL), f32),
        "be2": jnp.zeros((1, D_MODEL), f32),
        # linear1: (dim_feedforward, d_model), linear2: (d_model, dim_feedforward)
        "w1": 0.1 * jax.random.normal(ks[8], (DIM_FF, D_MODEL), f32),
        "b1": 0.1 * jax.random.normal(ks[9], (1, DIM_FF), f32),
        "w2": 0.1 * jax.random.normal(ks[10], (D_MODEL, DIM_FF), f32),
        "b2": 0.1 * jax.random.normal(ks[11], (1, D_MODEL), f32),
    }


if __name__ == "__main__":
    key = jax.random.PRNGKey(0)
    k_src, k_par = jax.random.split(key)
    src = jax.random.normal(k_src, (SEQ, BATCH, D_MODEL), jnp.float32)  # (S, B, D)
    params = make_params(k_par)

    out = transformer_encoder_layer(src, params)
    out = jax.block_until_ready(out)

    ref = jax.block_until_ready(reference(src, params))
    # exact softmax normalization -> tighter tolerance than before
    np.testing.assert_allclose(np.asarray(out), np.asarray(ref), rtol=1e-4, atol=1e-4)
    assert out.shape == (SEQ, BATCH, D_MODEL)
    print("KERNEL_OK")
</pallas_src>

<mosaic_0001>
module attributes {stable_mosaic.version = 11 : i64} {
  func.func @encoder_layer_kernel(%arg0: memref<16x32xf32, #tpu.memory_space<vmem>>, %arg1: memref<32x96xf32, #tpu.memory_space<vmem>>, %arg2: memref<1x96xf32, #tpu.memory_space<vmem>>, %arg3: memref<32x32xf32, #tpu.memory_space<vmem>>, %arg4: memref<6x32xf32, #tpu.memory_space<vmem>>, %arg5: memref<32x64xf32, #tpu.memory_space<vmem>>, %arg6: memref<1x64xf32, #tpu.memory_space<vmem>>, %arg7: memref<64x32xf32, #tpu.memory_space<vmem>>, %arg8: memref<16x32xf32, #tpu.memory_space<vmem>>) attributes {dimension_semantics = [], scalar_prefetch = 0 : i64, scratch_operands = 0 : i64, tpu.core_type = #tpu.core_type<tc>} {
    %c0 = arith.constant 0 : index
    %c0_0 = arith.constant 0 : index
    %0 = vector.load %arg0[%c0, %c0_0] : memref<16x32xf32, #tpu.memory_space<vmem>>, vector<16x32xf32>
    %c0_1 = arith.constant 0 : index
    %c0_2 = arith.constant 0 : index
    %1 = vector.load %arg4[%c0_1, %c0_2] : memref<6x32xf32, #tpu.memory_space<vmem>>, vector<1x32xf32>
    %c1 = arith.constant 1 : index
    %c0_3 = arith.constant 0 : index
    %2 = vector.load %arg4[%c1, %c0_3] : memref<6x32xf32, #tpu.memory_space<vmem>>, vector<1x32xf32>
    %c2 = arith.constant 2 : index
    %c0_4 = arith.constant 0 : index
    %3 = vector.load %arg4[%c2, %c0_4] : memref<6x32xf32, #tpu.memory_space<vmem>>, vector<1x32xf32>
    %c3 = arith.constant 3 : index
    %c0_5 = arith.constant 0 : index
    %4 = vector.load %arg4[%c3, %c0_5] : memref<6x32xf32, #tpu.memory_space<vmem>>, vector<1x32xf32>
    %c4 = arith.constant 4 : index
    %c0_6 = arith.constant 0 : index
    %5 = vector.load %arg4[%c4, %c0_6] : memref<6x32xf32, #tpu.memory_space<vmem>>, vector<1x32xf32>
    %c5 = arith.constant 5 : index
    %c0_7 = arith.constant 0 : index
    %6 = vector.load %arg4[%c5, %c0_7] : memref<6x32xf32, #tpu.memory_space<vmem>>, vector<1x32xf32>
    %cst = arith.constant dense<0.000000e+00> : vector<16xf32>
    %7 = vector.multi_reduction <add>, %0, %cst [1] : vector<16x32xf32> to vector<16xf32>
    %8 = vector.shape_cast %7 : vector<16xf32> to vector<16x1xf32>
    %cst_8 = arith.constant 3.200000e+01 : f32
    %9 = vector.broadcast %cst_8 : f32 to vector<16x1xf32>
    %10 = arith.divf %8, %9 : vector<16x1xf32>
    %11 = vector.broadcast %10 : vector<16x1xf32> to vector<16x32xf32>
    %12 = arith.subf %0, %11 : vector<16x32xf32>
    %13 = arith.mulf %12, %12 : vector<16x32xf32>
    %cst_9 = arith.constant dense<0.000000e+00> : vector<16xf32>
    %14 = vector.multi_reduction <add>, %13, %cst_9 [1] : vector<16x32xf32> to vector<16xf32>
    %15 = vector.shape_cast %14 : vector<16xf32> to vector<16x1xf32>
    %cst_10 = arith.constant 3.200000e+01 : f32
    %16 = vector.broadcast %cst_10 : f32 to vector<16x1xf32>
    %17 = arith.divf %15, %16 : vector<16x1xf32>
    %18 = vector.broadcast %10 : vector<16x1xf32> to vector<16x32xf32>
    %19 = arith.subf %0, %18 : vector<16x32xf32>
    %cst_11 = arith.constant 9.99999974E-6 : f32
    %20 = vector.broadcast %cst_11 : f32 to vector<16x1xf32>
    %21 = arith.addf %17, %20 : vector<16x1xf32>
    %22 = math.rsqrt %21 : vector<16x1xf32>
    %23 = vector.broadcast %22 : vector<16x1xf32> to vector<16x32xf32>
    %24 = arith.mulf %19, %23 : vector<16x32xf32>
    %25 = vector.broadcast %2 : vector<1x32xf32> to vector<16x32xf32>
    %26 = arith.mulf %24, %25 : vector<16x32xf32>
    %27 = vector.broadcast %3 : vector<1x32xf32> to vector<16x32xf32>
    %28 = arith.addf %26, %27 : vector<16x32xf32>
    %c0_12 = arith.constant 0 : index
    %c0_13 = arith.constant 0 : index
    %29 = vector.load %arg1[%c0_12, %c0_13] : memref<32x96xf32, #tpu.memory_space<vmem>>, vector<32x96xf32>
    %cst_14 = arith.constant dense<0.000000e+00> : vector<16x96xf32>
    %30 = tpu.matmul %28, %29, %cst_14 {dimension_numbers = #tpu.dot_dimension_numbers<[1], [0], [0], [1], [0, 0, 1, 1], [], []>} : vector<16x32xf32>, vector<32x96xf32>, vector<16x96xf32> -> vector<16x96xf32>
    %c0_15 = arith.constant 0 : index
    %c0_16 = arith.constant 0 : index
    %31 = vector.load %arg2[%c0_15, %c0_16] : memref<1x96xf32, #tpu.memory_space<vmem>>, vector<1x96xf32>
    %32 = vector.broadcast %31 : vector<1x96xf32> to vector<16x96xf32>
    %33 = arith.addf %30, %32 : vector<16x96xf32>
    %34 = vector.extract_strided_slice %33 {offsets = [0, 0], sizes = [8, 8], strides = [1, 1]} : vector<16x96xf32> to vector<8x8xf32>
    %35 = vector.shape_cast %34 : vector<8x8xf32> to vector<1x8x8xf32>
    %36 = vector.extract_strided_slice %33 {offsets = [0, 8], sizes = [8, 8], strides = [1, 1]} : vector<16x96xf32> to vector<8x8xf32>
    %37 = vector.shape_cast %36 : vector<8x8xf32> to vector<1x8x8xf32>
    %38 = vector.extract_strided_slice %33 {offsets = [0, 16], sizes = [8, 8], strides = [1, 1]} : vector<16x96xf32> to vector<8x8xf32>
    %39 = vector.shape_cast %38 : vector<8x8xf32> to vector<1x8x8xf32>
    %40 = vector.extract_strided_slice %33 {offsets = [0, 24], sizes = [8, 8], strides = [1, 1]} : vector<16x96xf32> to vector<8x8xf32>
    %41 = vector.shape_cast %40 : vector<8x8xf32> to vector<1x8x8xf32>
    %42 = vector.extract_strided_slice %33 {offsets = [8, 0], sizes = [8, 8], strides = [1, 1]} : vector<16x96xf32> to vector<8x8xf32>
    %43 = vector.shape_cast %42 : vector<8x8xf32> to vector<1x8x8xf32>
    %44 = vector.extract_strided_slice %33 {offsets = [8, 8], sizes = [8, 8], strides = [1, 1]} : vector<16x96xf32> to vector<8x8xf32>
    %45 = vector.shape_cast %44 : vector<8x8xf32> to vector<1x8x8xf32>
    %46 = vector.extract_strided_slice %33 {offsets = [8, 16], sizes = [8, 8], strides = [1, 1]} : vector<16x96xf32> to vector<8x8xf32>
    %47 = vector.shape_cast %46 : vector<8x8xf32> to vector<1x8x8xf32>
    %48 = vector.extract_strided_slice %33 {offsets = [8, 24], sizes = [8, 8], strides = [1, 1]} : vector<16x96xf32> to vector<8x8xf32>
    %49 = vector.shape_cast %48 : vector<8x8xf32> to vector<1x8x8xf32>
    %50 = tpu.concatenate %35, %37, %39, %41, %43, %45, %47, %49 in 0 : vector<1x8x8xf32>, vector<1x8x8xf32>, vector<1x8x8xf32>, vector<1x8x8xf32>, vector<1x8x8xf32>, vector<1x8x8xf32>, vector<1x8x8xf32>, vector<1x8x8xf32> -> vector<8x8x8xf32>
    %51 = vector.extract_strided_slice %33 {offsets = [0, 32], sizes = [8, 8], strides = [1, 1]} : vector<16x96xf32> to vector<8x8xf32>
    %52 = vector.shape_cast %51 : vector<8x8xf32> to vector<1x8x8xf32>
    %53 = vector.extract_strided_slice %33 {offsets = [0, 40], sizes = [8, 8], strides = [1, 1]} : vector<16x96xf32> to vector<8x8xf32>
    %54 = vector.shape_cast %53 : vector<8x8xf32> to vector<1x8x8xf32>
    %55 = vector.extract_strided_slice %33 {offsets = [0, 48], sizes = [8, 8], strides = [1, 1]} : vector<16x96xf32> to vector<8x8xf32>
    %56 = vector.shape_cast %55 : vector<8x8xf32> to vector<1x8x8xf32>
    %57 = vector.extract_strided_slice %33 {offsets = [0, 56], sizes = [8, 8], strides = [1, 1]} : vector<16x96xf32> to vector<8x8xf32>
    %58 = vector.shape_cast %57 : vector<8x8xf32> to vector<1x8x8xf32>
    %59 = vector.extract_strided_slice %33 {offsets = [8, 32], sizes = [8, 8], strides = [1, 1]} : vector<16x96xf32> to vector<8x8xf32>
    %60 = vector.shape_cast %59 : vector<8x8xf32> to vector<1x8x8xf32>
    %61 = vector.extract_strided_slice %33 {offsets = [8, 40], sizes = [8, 8], strides = [1, 1]} : vector<16x96xf32> to vector<8x8xf32>
    %62 = vector.shape_cast %61 : vector<8x8xf32> to vector<1x8x8xf32>
    %63 = vector.extract_strided_slice %33 {offsets = [8, 48], sizes = [8, 8], strides = [1, 1]} : vector<16x96xf32> to vector<8x8xf32>
    %64 = vector.shape_cast %63 : vector<8x8xf32> to vector<1x8x8xf32>
    %65 = vector.extract_strided_slice %33 {offsets = [8, 56], sizes = [8, 8], strides = [1, 1]} : vector<16x96xf32> to vector<8x8xf32>
    %66 = vector.shape_cast %65 : vector<8x8xf32> to vector<1x8x8xf32>
    %67 = tpu.concatenate %52, %54, %56, %58, %60, %62, %64, %66 in 0 : vector<1x8x8xf32>, vector<1x8x8xf32>, vector<1x8x8xf32>, vector<1x8x8xf32>, vector<1x8x8xf32>, vector<1x8x8xf32>, vector<1x8x8xf32>, vector<1x8x8xf32> -> vector<8x8x8xf32>
    %68 = vector.extract_strided_slice %33 {offsets = [0, 64], sizes = [8, 8], strides = [1, 1]} : vector<16x96xf32> to vector<8x8xf32>
    %69 = vector.shape_cast %68 : vector<8x8xf32> to vector<1x8x8xf32>
    %70 = vector.extract_strided_slice %33 {offsets = [0, 72], sizes = [8, 8], strides = [1, 1]} : vector<16x96xf32> to vector<8x8xf32>
    %71 = vector.shape_cast %70 : vector<8x8xf32> to vector<1x8x8xf32>
    %72 = vector.extract_strided_slice %33 {offsets = [0, 80], sizes = [8, 8], strides = [1, 1]} : vector<16x96xf32> to vector<8x8xf32>
    %73 = vector.shape_cast %72 : vector<8x8xf32> to vector<1x8x8xf32>
    %74 = vector.extract_strided_slice %33 {offsets = [0, 88], sizes = [8, 8], strides = [1, 1]} : vector<16x96xf32> to vector<8x8xf32>
    %75 = vector.shape_cast %74 : vector<8x8xf32> to vector<1x8x8xf32>
    %76 = vector.extract_strided_slice %33 {offsets = [8, 64], sizes = [8, 8], strides = [1, 1]} : vector<16x96xf32> to vector<8x8xf32>
    %77 = vector.shape_cast %76 : vector<8x8xf32> to vector<1x8x8xf32>
    %78 = vector.extract_strided_slice %33 {offsets = [8, 72], sizes = [8, 8], strides = [1, 1]} : vector<16x96xf32> to vector<8x8xf32>
    %79 = vector.shape_cast %78 : vector<8x8xf32> to vector<1x8x8xf32>
    %80 = vector.extract_strided_slice %33 {offsets = [8, 80], sizes = [8, 8], strides = [1, 1]} : vector<16x96xf32> to vector<8x8xf32>
    %81 = vector.shape_cast %80 : vector<8x8xf32> to vector<1x8x8xf32>
    %82 = vector.extract_strided_slice %33 {offsets = [8, 88], sizes = [8, 8], strides = [1, 1]} : vector<16x96xf32> to vector<8x8xf32>
    %83 = vector.shape_cast %82 : vector<8x8xf32> to vector<1x8x8xf32>
    %84 = tpu.concatenate %69, %71, %73, %75, %77, %79, %81, %83 in 0 : vector<1x8x8xf32>, vector<1x8x8xf32>, vector<1x8x8xf32>, vector<1x8x8xf32>, vector<1x8x8xf32>, vector<1x8x8xf32>, vector<1x8x8xf32>, vector<1x8x8xf32> -> vector<8x8x8xf32>
    "tpu.trace_start"() <{level = 10 : i32, message = "nqd,nkd->nqk"}> : () -> ()
    %cst_17 = arith.constant dense<0.000000e+00> : vector<8x8x8xf32>
    %85 = tpu.matmul %50, %67, %cst_17 {dimension_numbers = #tpu.dot_dimension_numbers<[2], [2], [1], [1], [0, 0, 0, 1, 1, 1], [0], [0]>} : vector<8x8x8xf32>, vector<8x8x8xf32>, vector<8x8x8xf32> -> vector<8x8x8xf32>
    "tpu.trace_stop"() : () -> ()
    %cst_18 = arith.constant dense<0xFF800000> : vector<8x8xf32>
    %86 = vector.multi_reduction <maximumf>, %85, %cst_18 [2] : vector<8x8x8xf32> to vector<8x8xf32>
    %87 = vector.shape_cast %86 : vector<8x8xf32> to vector<8x8x1xf32>
    %88 = vector.broadcast %87 : vector<8x8x1xf32> to vector<8x8x8xf32>
    %89 = arith.subf %85, %88 : vector<8x8x8xf32>
    %90 = math.exp %89 : vector<8x8x8xf32>
    %cst_19 = arith.constant dense<0.000000e+00> : vector<8x8xf32>
    %91 = vector.multi_reduction <add>, %90, %cst_19 [2] : vector<8x8x8xf32> to vector<8x8xf32>
    %92 = vector.shape_cast %91 : vector<8x8xf32> to vector<8x8x1xf32>
    %93 = vector.broadcast %92 : vector<8x8x1xf32> to vector<8x8x8xf32>
    %94 = arith.divf %90, %93 : vector<8x8x8xf32>
    "tpu.trace_start"() <{level = 10 : i32, message = "nqk,nkd->nqd"}> : () -> ()
    %cst_20 = arith.constant dense<0.000000e+00> : vector<8x8x8xf32>
    %95 = tpu.matmul %94, %84, %cst_20 {dimension_numbers = #tpu.dot_dimension_numbers<[2], [1], [1], [2], [0, 0, 0, 1, 1, 2], [0], [0]>} : vector<8x8x8xf32>, vector<8x8x8xf32>, vector<8x8x8xf32> -> vector<8x8x8xf32>
    "tpu.trace_stop"() : () -> ()
    %96 = vector.extract_strided_slice %95 {offsets = [0, 0, 0], sizes = [1, 8, 8], strides = [1, 1, 1]} : vector<8x8x8xf32> to vector<1x8x8xf32>
    %97 = vector.shape_cast %96 : vector<1x8x8xf32> to vector<8x8xf32>
    %98 = vector.extract_strided_slice %95 {offsets = [1, 0, 0], sizes = [1, 8, 8], strides = [1, 1, 1]} : vector<8x8x8xf32> to vector<1x8x8xf32>
    %99 = vector.shape_cast %98 : vector<1x8x8xf32> to vector<8x8xf32>
    %100 = vector.extract_strided_slice %95 {offsets = [2, 0, 0], sizes = [1, 8, 8], strides = [1, 1, 1]} : vector<8x8x8xf32> to vector<1x8x8xf32>
    %101 = vector.shape_cast %100 : vector<1x8x8xf32> to vector<8x8xf32>
    %102 = vector.extract_strided_slice %95 {offsets = [3, 0, 0], sizes = [1, 8, 8], strides = [1, 1, 1]} : vector<8x8x8xf32> to vector<1x8x8xf32>
    %103 = vector.shape_cast %102 : vector<1x8x8xf32> to vector<8x8xf32>
    %104 = tpu.concatenate %97, %99, %101, %103 in 1 : vector<8x8xf32>, vector<8x8xf32>, vector<8x8xf32>, vector<8x8xf32> -> vector<8x32xf32>
    %105 = vector.extract_strided_slice %95 {offsets = [4, 0, 0], sizes = [1, 8, 8], strides = [1, 1, 1]} : vector<8x8x8xf32> to vector<1x8x8xf32>
    %106 = vector.shape_cast %105 : vector<1x8x8xf32> to vector<8x8xf32>
    %107 = vector.extract_strided_slice %95 {offsets = [5, 0, 0], sizes = [1, 8, 8], strides = [1, 1, 1]} : vector<8x8x8xf32> to vector<1x8x8xf32>
    %108 = vector.shape_cast %107 : vector<1x8x8xf32> to vector<8x8xf32>
    %109 = vector.extract_strided_slice %95 {offsets = [6, 0, 0], sizes = [1, 8, 8], strides = [1, 1, 1]} : vector<8x8x8xf32> to vector<1x8x8xf32>
    %110 = vector.shape_cast %109 : vector<1x8x8xf32> to vector<8x8xf32>
    %111 = vector.extract_strided_slice %95 {offsets = [7, 0, 0], sizes = [1, 8, 8], strides = [1, 1, 1]} : vector<8x8x8xf32> to vector<1x8x8xf32>
    %112 = vector.shape_cast %111 : vector<1x8x8xf32> to vector<8x8xf32>
    %113 = tpu.concatenate %106, %108, %110, %112 in 1 : vector<8x8xf32>, vector<8x8xf32>, vector<8x8xf32>, vector<8x8xf32> -> vector<8x32xf32>
    %114 = tpu.concatenate %104, %113 in 0 : vector<8x32xf32>, vector<8x32xf32> -> vector<16x32xf32>
    %c0_21 = arith.constant 0 : index
    %c0_22 = arith.constant 0 : index
    %115 = vector.load %arg3[%c0_21, %c0_22] : memref<32x32xf32, #tpu.memory_space<vmem>>, vector<32x32xf32>
    %cst_23 = arith.constant dense<0.000000e+00> : vector<16x32xf32>
    %116 = tpu.matmul %114, %115, %cst_23 {dimension_numbers = #tpu.dot_dimension_numbers<[1], [0], [0], [1], [0, 0, 1, 1], [], []>} : vector<16x32xf32>, vector<32x32xf32>, vector<16x32xf32> -> vector<16x32xf32>
    %117 = vector.broadcast %1 : vector<1x32xf32> to vector<16x32xf32>
    %118 = arith.addf %116, %117 : vector<16x32xf32>
    %119 = arith.addf %0, %118 : vector<16x32xf32>
    %cst_24 = arith.constant dense<0.000000e+00> : vector<16xf32>
    %120 = vector.multi_reduction <add>, %119, %cst_24 [1] : vector<16x32xf32> to vector<16xf32>
    %121 = vector.shape_cast %120 : vector<16xf32> to vector<16x1xf32>
    %cst_25 = arith.constant 3.200000e+01 : f32
    %122 = vector.broadcast %cst_25 : f32 to vector<16x1xf32>
    %123 = arith.divf %121, %122 : vector<16x1xf32>
    %124 = vector.broadcast %123 : vector<16x1xf32> to vector<16x32xf32>
    %125 = arith.subf %119, %124 : vector<16x32xf32>
    %126 = arith.mulf %125, %125 : vector<16x32xf32>
    %cst_26 = arith.constant dense<0.000000e+00> : vector<16xf32>
    %127 = vector.multi_reduction <add>, %126, %cst_26 [1] : vector<16x32xf32> to vector<16xf32>
    %128 = vector.shape_cast %127 : vector<16xf32> to vector<16x1xf32>
    %cst_27 = arith.constant 3.200000e+01 : f32
    %129 = vector.broadcast %cst_27 : f32 to vector<16x1xf32>
    %130 = arith.divf %128, %129 : vector<16x1xf32>
    %131 = vector.broadcast %123 : vector<16x1xf32> to vector<16x32xf32>
    %132 = arith.subf %119, %131 : vector<16x32xf32>
    %cst_28 = arith.constant 9.99999974E-6 : f32
    %133 = vector.broadcast %cst_28 : f32 to vector<16x1xf32>
    %134 = arith.addf %130, %133 : vector<16x1xf32>
    %135 = math.rsqrt %134 : vector<16x1xf32>
    %136 = vector.broadcast %135 : vector<16x1xf32> to vector<16x32xf32>
    %137 = arith.mulf %132, %136 : vector<16x32xf32>
    %138 = vector.broadcast %4 : vector<1x32xf32> to vector<16x32xf32>
    %139 = arith.mulf %137, %138 : vector<16x32xf32>
    %140 = vector.broadcast %5 : vector<1x32xf32> to vector<16x32xf32>
    %141 = arith.addf %139, %140 : vector<16x32xf32>
    %c0_29 = arith.constant 0 : index
    %c0_30 = arith.constant 0 : index
    %142 = vector.load %arg5[%c0_29, %c0_30] : memref<32x64xf32, #tpu.memory_space<vmem>>, vector<32x64xf32>
    %cst_31 = arith.constant dense<0.000000e+00> : vector<16x64xf32>
    %143 = tpu.matmul %141, %142, %cst_31 {dimension_numbers = #tpu.dot_dimension_numbers<[1], [0], [0], [1], [0, 0, 1, 1], [], []>} : vector<16x32xf32>, vector<32x64xf32>, vector<16x64xf32> -> vector<16x64xf32>
    %c0_32 = arith.constant 0 : index
    %c0_33 = arith.constant 0 : index
    %144 = vector.load %arg6[%c0_32, %c0_33] : memref<1x64xf32, #tpu.memory_space<vmem>>, vector<1x64xf32>
    %145 = vector.broadcast %144 : vector<1x64xf32> to vector<16x64xf32>
    %146 = arith.addf %143, %145 : vector<16x64xf32>
    %cst_34 = arith.constant 0.000000e+00 : f32
    %147 = vector.broadcast %cst_34 : f32 to vector<16x64xf32>
    %148 = arith.maximumf %146, %147 : vector<16x64xf32>
    %c0_35 = arith.constant 0 : index
    %c0_36 = arith.constant 0 : index
    %149 = vector.load %arg7[%c0_35, %c0_36] : memref<64x32xf32, #tpu.memory_space<vmem>>, vector<64x32xf32>
    %cst_37 = arith.constant dense<0.000000e+00> : vector<16x32xf32>
    %150 = tpu.matmul %148, %149, %cst_37 {dimension_numbers = #tpu.dot_dimension_numbers<[1], [0], [0], [1], [0, 0, 1, 1], [], []>} : vector<16x64xf32>, vector<64x32xf32>, vector<16x32xf32> -> vector<16x32xf32>
    %151 = vector.broadcast %6 : vector<1x32xf32> to vector<16x32xf32>
    %152 = arith.addf %150, %151 : vector<16x32xf32>
    %153 = arith.addf %119, %152 : vector<16x32xf32>
    %c0_38 = arith.constant 0 : index
    %c0_39 = arith.constant 0 : index
    %154 = vector.load %arg8[%c0_38, %c0_39] : memref<16x32xf32, #tpu.memory_space<vmem>>, vector<16x32xf32>
    tpu.vector_store %arg8[%c0_38, %c0_39], %153 {strides = array<i32>} : memref<16x32xf32, #tpu.memory_space<vmem>>, vector<16x32xf32>,
    return
  }
}

</mosaic_0001>

<bundles_post_ra>
// kernel: tpu_custom_call.1
= control target key start
LH: loop header
LB: loop body
LE: loop exit
PB: predicated region body
PF: predicated region fallthrough
CT: control target
= control target key end

     0   :  { %13 = vsyncpa [#allocation3], 0  ;;  %s2572_s0 = inlined_call_operand.hbm [shape: f32[16,32], index: 0, kind: input, shape index: {}]   ;;  %s2573_s1 = inlined_call_operand.vmem [shape: f32[32,96], index: 1, kind: input, shape index: {}]   ;;  %s2574_s2 = inlined_call_operand.vmem [shape: f32[1,96], index: 2, kind: input, shape index: {}]   ;;  %s2575_s3 = inlined_call_operand.vmem [shape: f32[32,32], index: 3, kind: input, shape index: {}]   ;;  %s2576_s4 = inlined_call_operand.hbm [shape: f32[6,32], index: 4, kind: input, shape index: {}]   ;;  %s2577_s5 = inlined_call_operand.vmem [shape: f32[32,64], index: 5, kind: input, shape index: {}]   ;;  %s2578_s6 = inlined_call_operand.vmem [shape: f32[1,64], index: 6, kind: input, shape index: {}]   ;;  %s2579_s7 = inlined_call_operand.vmem [shape: f32[64,32], index: 7, kind: input, shape index: {}]   ;;  %s2580_s8 = inlined_call_operand.hbm [shape: f32[16,32], index: 8, kind: output, shape index: {}]  }
   0x1   :  { %14 = vsyncpa [#allocation6], 0 }
   0x2   :  { %15 = vsyncpa [#allocation4], 0  ;;  %s2238_s27 = smov [#allocation2]  }
   0x3   :  { %s21_s28 = sshll.u32 %s2238_s27, 4  ;;  %s22_s28 = int_to_ptr.vmem [resolvable:$true] %s21_s28 }
   0x4   :  { %s2180_s29 = scalar_lea.vmem %s22_s28, 256  ;;  %p2185_p1 = scmp.lt.s32.totalorder %s22_s28, %s22_s28 }
   0x5   :  { %p2181_p0 = scmp.ne.s32.totalorder %s22_s28, %s2180_s29  ;;  %p2186_p2 = scmp.lt.s32.totalorder %s2180_s29, %s2180_s29 }
   0x7   :  { %p2187_p3 = por %p2186_p2, %p2185_p1 }
   0x9   :  { %p2188_p4 = pnand %p2187_p3, %p2181_p0 }
   0xb   :  { %2191 = shalt.err (!%p2188_p4)
}
   0xc   :  { %s2239_s30 = smov 128   ;;  %s2240_s9 = smov 8  }
   0xd   :  { %27 = dma.hbm_to_vmem [thread:$0]  %s2572_s0, 256, %s22_s28, [#allocation3], %s2239_s30, %s2239_s30, %s2240_s9  }
   0xe   :  { %s2241_s12 = smov [#allocation5]  }
   0xf   :  { %s40_s13 = sshll.u32 %s2241_s12, 4  ;;  %s41_s13 = int_to_ptr.vmem [resolvable:$true] %s40_s13 }
  0x10   :  { %s2200_s14 = scalar_lea.vmem %s41_s13, 128  ;;  %p2205_p6 = scmp.lt.s32.totalorder %s41_s13, %s41_s13 }
  0x11   :  { %p2201_p5 = scmp.ne.s32.totalorder %s41_s13, %s2200_s14  ;;  %p2206_p7 = scmp.lt.s32.totalorder %s2200_s14, %s2200_s14 }
  0x13   :  { %p2207_p8 = por %p2206_p7, %p2205_p6 }
  0x15   :  { %p2208_p9 = pnand %p2207_p8, %p2201_p5 }
  0x17   :  { %2211 = shalt.err (!%p2208_p9)
}
  0x18   :  { %43 = dma.hbm_to_vmem [thread:$0]  %s2576_s4, 128, %s41_s13, [#allocation6]  }
  0x19   :  { %2232 = dma.done.wait [#allocation3], 256  }
  0x1a   :  { %2233 = vsyncadd [#allocation3], 4294967040 }
  0x1b   :  { %2234 = dma.done.wait [#allocation6], 128  }
  0x1c   :  { %2235 = vsyncadd [#allocation6], 4294967168  ;;  %vm64_vm0 = vcmask 261120   ;;  %v2306_v0 = vld [vmem:[#allocation2] sm:$0xff]  ;;  %v2308_v1 = vld [vmem:[#allocation2 + $0x8] sm:$0xff]  ;;  %v2242_v34 = vmov 0.0  }
  0x1d   :  { %v65_v2 = vsel %vm64_vm0, %v2306_v0, 0.0  ;;  %v68_v3 = vsel %vm64_vm0, %v2308_v1, 0.0  ;;  %v107_v14 = vld [vmem:[%s2573_s1 + $0x18] sm:$0xff]  ;;  %v106_v15 = vld [vmem:[%s2573_s1 + $0x10] sm:$0xff]  ;;  %v105_v16 = vld [vmem:[%s2573_s1 + $0x8] sm:$0xff]  ;;  %2007 = vmatprep.subr.mxu0 %v2242_v34  ;;  %vm2243_vm1 = vmmov 0  }
  0x1e   :  { %66 = vadd.xlane.f32.xlu0 %v65_v2  ;;  %1986 = vmatprep.subr.mxu1 %v107_v14  ;;  %v104_v17 = vld [vmem:[%s2573_s1] sm:$0xff]  ;;  %v1886_v25 = vld [vmem:[#allocation5 + $0x1] ss:$0 sm:$0xff]  ;;  %v1887_v27 = vld [vmem:[#allocation5 + $0x2] ss:$0 sm:$0xff]  ;;  %s2244_s24 = smov 112  }
  0x1f   :  { %1987 = vmatpush3.msra.mxu1 %v107_v14  ;;  %v1888_v36 = vld [vmem:[%s2574_s2] ss:$0 sm:$0xff]  ;;  %2009 = vmatprep.mubr.msk.f32.mxu0 %vm2243_vm1, %v2242_v34  ;;  %s2245_s25 = smov 120   ;;  %s2246_s26 = smov 104   ;;  %vm212_vm2 = vcmask 64512   ;;  %vm1528_vm3 = vcmask 130048  }
  0x20   :  { %1988 = vmatprep.subr.mxu1 %v106_v15  ;;  %s2247_s2 = smov 96   ;;  %s2248_s27 = smov 64   ;;  %vm1530_vm4 = vcmask 195584   ;;  %vm1782_vm5 = vcmask 523264  }
  0x21   :  { %1989 = vmatpush3.msra.mxu1 %v106_v15  ;;  %s2249_s16 = smov 16   ;;  %s2250_s0 = smov 24  }
  0x22   :  { %69 = vadd.xlane.f32.xlu0 %v68_v3  ;;  %1990 = vmatprep.subr.mxu1 %v105_v16 }
  0x23   :  { %1991 = vmatpush3.msra.mxu1 %v105_v16 }
  0x24   :  { %1992 = vmatprep.subr.mxu1 %v104_v17 }
  0x25   :  { %1993 = vmatpush3.msra.mxu1 %v104_v17 }
  0x26   :  { %1997 = vmatprep.subr.mxu1 %v2242_v34 }
  0xa7   :  { %v67_v4 = vpop.xlane.xlu0 %66 }
  0xa8   :  { %v72_v5 = vmul.f32 0.03125, %v67_v4 }
  0xaa   :  { %v74_v6 = vsub.f32 %v2306_v0, %v72_v5 }
  0xab   :  { %v70_v7 = vpop.xlane.xlu0 %69 }
  0xac   :  { %v73_v8 = vmul.f32 0.03125, %v70_v7  ;;  %v76_v9 = vmul.f32 %v74_v6, %v74_v6 }
  0xae   :  { %v75_v10 = vsub.f32 %v2308_v1, %v73_v8  ;;  %v78_v11 = vsel %vm64_vm0, %v76_v9, 0.0 }
  0xaf   :  { %79 = vadd.xlane.f32.xlu1 %v78_v11 }
  0xb0   :  { %v77_v12 = vmul.f32 %v75_v10, %v75_v10 }
  0xb2   :  { %v81_v13 = vsel %vm64_vm0, %v77_v12, 0.0 }
  0xb3   :  { %82 = vadd.xlane.f32.xlu1 %v81_v13 }
 0x138   :  { %v80_v18 = vpop.xlane.xlu1 %79 }
 0x139   :  { %v84_v19 = vmul.f32 0.03125, %v80_v18 }
 0x13b   :  { %v86_v20 = vadd.f32 1e-05, %v84_v19 }
 0x13c   :  { %v83_v21 = vpop.xlane.xlu1 %82 }
 0x13d   :  { %2132 = vrsqrt.f32 %v86_v20  ;;  %v85_v22 = vmul.f32 0.03125, %v83_v21 }
 0x13f   :  { %v87_v23 = vadd.f32 1e-05, %v85_v22 }
 0x141   :  { %2134 = vrsqrt.f32 %v87_v23 }
 0x14a   :  { %v2133_v24 = vpop.eup %2132 }
 0x14b   :  { %v90_v26 = vmul.f32 %v2133_v24, %v74_v6 }
 0x14d   :  { %v96_v28 = vmul.f32 %v1886_v25, %v90_v26 }
 0x14e   :  { %v2135_v29 = vpop.eup %2134 }
 0x14f   :  { %v91_v30 = vmul.f32 %v2135_v29, %v75_v10  ;;  %v102_v31 = vadd.f32 %v1887_v27, %v96_v28 }
 0x151   :  { %v97_v32 = vmul.f32 %v1886_v25, %v91_v30  ;;  %1994 = vmatprep.mubr.msk.f32.mxu1 %vm64_vm0, %v102_v31 }
 0x153   :  { %v103_v33 = vadd.f32 %v1887_v27, %v97_v32 }
 0x155   :  { %1995 = vmatmul.mubr.msk.f32.vlgmr.msra.gmra.mxu1 %vm64_vm0, %v103_v33 }
 0x156   :  { %1999 = vmatprep.mubr.msk.f32.mxu1 %vm2243_vm1, %v2242_v34 }
 0x215   :  { %v1996_v35 = vpop.f32.mrf.mxu1 }
 0x216   :  { %v2345_v39 = vadd.f32 %v1996_v35, %v1888_v36 }
 0x217   :  { %v187_v37 = vpop.f32.mrf.mxu1 }
 0x218   :  { %v2341_v38 = vadd.f32 %v1888_v36, %v187_v37 }
 0x21a   :  { %199 = vrot.lane.b32.xlu1 %v2341_v38, %s2244_s24  ;;  %197 = vrot.lane.b32.xlu0 %v2341_v38, %s2245_s25 }
 0x21e   :  { %201 = vrot.lane.b32.xlu1 %v2341_v38, %s2246_s26  ;;  %206 = vrot.lane.b32.xlu0 %v2345_v39, %s2244_s24 }
 0x222   :  { %204 = vrot.lane.b32.xlu1 %v2345_v39, %s2245_s25  ;;  %210 = vrot.lane.b32.xlu0 %v2341_v38, %s2247_s2 }
 0x226   :  { %208 = vrot.lane.b32.xlu1 %v2345_v39, %s2246_s26 }
 0x28c   :  { %v2352_v40 = vpop.permute.xlu1 %199  ;;  %v2354_v41 = vpop.permute.xlu0 %197 }
 0x28d   :  { %363 = vrot.lane.b32.xlu0 %v2352_v40, %s2247_s2  ;;  %287 = vrot.lane.b32.xlu1 %v2354_v41, %s2247_s2 }
 0x290   :  { %v2358_v42 = vpop.permute.xlu1 %201  ;;  %v2360_v43 = vpop.permute.xlu0 %206 }
 0x291   :  { %515 = vrot.lane.b32.xlu0 %v2345_v39, %s2247_s2  ;;  %439 = vrot.lane.b32.xlu1 %v2358_v42, %s2247_s2 }
 0x294   :  { %v2364_v44 = vpop.permute.xlu1 %204  ;;  %v211_v45 = vpop.permute.xlu0 %210 }
 0x295   :  { %591 = vrot.lane.b32.xlu1 %v2364_v44, %s2247_s2  ;;  %667 = vrot.lane.b32.xlu0 %v2360_v43, %s2247_s2 }
 0x296   :  { %1998 = vmatpush3.xpose.msk.msra.mxu1 %vm212_vm2, %v211_v45 }
 0x297   :  { %2002 = vmatprep.subr.mxu1 %v2242_v34 }
 0x298   :  { %v2370_v46 = vpop.permute.xlu1 %208 }
 0x299   :  { %2000 = vmatmul.mubr.msk.f32.vlgmr.msra.gmra.mxu1 %vm212_vm2, %v2341_v38  ;;  %743 = vrot.lane.b32.xlu1 %v2370_v46, %s2247_s2 }
 0x29a   :  { %2004 = vmatprep.mubr.msk.f32.mxu1 %vm2243_vm1, %v2242_v34 }
 0x2ff   :  { %v288_v47 = vpop.permute.xlu1 %287  ;;  %v364_v48 = vpop.permute.xlu0 %363 }
 0x300   :  { %2003 = vmatpush3.xpose.msk.msra.mxu1 %vm212_vm2, %v288_v47  ;;  %2008 = vmatpush3.xpose.msk.msra.mxu0 %vm212_vm2, %v364_v48 }
 0x301   :  { %2012 = vmatprep.subr.mxu1 %v2242_v34  ;;  %2017 = vmatprep.subr.mxu0 %v2242_v34 }
 0x303   :  { %v440_v49 = vpop.permute.xlu1 %439  ;;  %2005 = vmatmul.mubr.msk.f32.vlgmr.msra.gmra.mxu1 %vm212_vm2, %v2354_v41  ;;  %2010 = vmatmul.mubr.msk.f32.vlgmr.msra.gmra.mxu0 %vm212_vm2, %v2352_v40  ;;  %v516_v50 = vpop.permute.xlu0 %515 }
 0x304   :  { %2013 = vmatpush3.xpose.msk.msra.mxu1 %vm212_vm2, %v440_v49  ;;  %2018 = vmatpush3.xpose.msk.msra.mxu0 %vm212_vm2, %v516_v50 }
 0x305   :  { %2014 = vmatprep.mubr.msk.f32.mxu1 %vm2243_vm1, %v2242_v34  ;;  %2019 = vmatprep.mubr.msk.f32.mxu0 %vm2243_vm1, %v2242_v34 }
 0x306   :  { %2022 = vmatprep.subr.mxu1 %v2242_v34  ;;  %2027 = vmatprep.subr.mxu0 %v2242_v34 }
 0x307   :  { %v592_v51 = vpop.permute.xlu1 %591  ;;  %2015 = vmatmul.mubr.msk.f32.vlgmr.msra.gmra.mxu1 %vm212_vm2, %v2358_v42  ;;  %2020 = vmatmul.mubr.msk.f32.vlgmr.msra.gmra.mxu0 %vm212_vm2, %v2345_v39  ;;  %v668_v52 = vpop.permute.xlu0 %667 }
 0x308   :  { %2023 = vmatpush3.xpose.msk.msra.mxu1 %vm212_vm2, %v592_v51  ;;  %2028 = vmatpush3.xpose.msk.msra.mxu0 %vm212_vm2, %v668_v52 }
 0x309   :  { %2024 = vmatprep.mubr.msk.f32.mxu1 %vm2243_vm1, %v2242_v34  ;;  %2029 = vmatprep.mubr.msk.f32.mxu0 %vm2243_vm1, %v2242_v34 }
 0x30a   :  { %2032 = vmatprep.subr.mxu1 %v2242_v34  ;;  %2037 = vmatprep.subr.mxu0 %v2242_v34 }
 0x30b   :  { %v744_v53 = vpop.permute.xlu1 %743  ;;  %2025 = vmatmul.mubr.msk.f32.vlgmr.msra.gmra.mxu1 %vm212_vm2, %v2364_v44  ;;  %2030 = vmatmul.mubr.msk.f32.vlgmr.msra.gmra.mxu0 %vm212_vm2, %v2360_v43 }
 0x30c   :  { %2033 = vmatpush3.xpose.msk.msra.mxu1 %vm212_vm2, %v744_v53  ;;  %2034 = vmatprep.mubr.msk.f32.mxu1 %vm2243_vm1, %v2242_v34 }
 0x30d   :  { %2042 = vmatprep.subr.mxu1 %v2242_v34  ;;  %2039 = vmatprep.mubr.msk.f32.mxu0 %vm2243_vm1, %v2242_v34 }
 0x30f   :  { %2035 = vmatmul.mubr.msk.f32.vlgmr.msra.gmra.mxu1 %vm212_vm2, %v2370_v46 }
 0x310   :  { %2044 = vmatprep.mubr.msk.f32.mxu1 %vm2243_vm1, %v2242_v34 }
 0x359   :  { %v283_v54 = vpop.f32.mrf.mxu1 }
 0x35a   :  { %v819_v55 = vsel %vm212_vm2, %v283_v54, -inf }
 0x35b   :  { %820 = vmax.xlane.f32.xlu0 %v819_v55  ;;  %v2001_v56 = vpop.f32.mrf.mxu1 }
 0x3c3   :  { %v359_v57 = vpop.f32.mrf.mxu1  ;;  %v435_v58 = vpop.f32.mrf.mxu0 }
 0x3c4   :  { %v822_v59 = vsel %vm212_vm2, %v359_v57, -inf  ;;  %v825_v60 = vsel %vm212_vm2, %v435_v58, -inf }
 0x3c5   :  { %823 = vmax.xlane.f32.xlu1 %v822_v59  ;;  %v2006_v61 = vpop.f32.mrf.mxu1  ;;  %826 = vmax.xlane.f32.xlu0 %v825_v60  ;;  %v2011_v62 = vpop.f32.mrf.mxu0 }
 0x3c7   :  { %v511_v63 = vpop.f32.mrf.mxu1  ;;  %v587_v2 = vpop.f32.mrf.mxu0 }
 0x3c8   :  { %v828_v3 = vsel %vm212_vm2, %v511_v63, -inf  ;;  %v831_v9 = vsel %vm212_vm2, %v587_v2, -inf }
 0x3c9   :  { %v2016_v4 = vpop.f32.mrf.mxu1  ;;  %829 = vmax.xlane.f32.xlu0 %v828_v3  ;;  %v2021_v5 = vpop.f32.mrf.mxu0 }
 0x3cb   :  { %v663_v6 = vpop.f32.mrf.mxu1  ;;  %v739_v7 = vpop.f32.mrf.mxu0 }
 0x3cc   :  { %v834_v8 = vsel %vm212_vm2, %v663_v6, -inf  ;;  %v837_v14 = vsel %vm212_vm2, %v739_v7, -inf }
 0x3cd   :  { %835 = vmax.xlane.f32.xlu1 %v834_v8  ;;  %v2026_v10 = vpop.f32.mrf.mxu1  ;;  %832 = vmax.xlane.f32.xlu0 %v831_v9  ;;  %v2031_v11 = vpop.f32.mrf.mxu0 }
 0x3cf   :  { %v815_v12 = vpop.f32.mrf.mxu1 }
 0x3d0   :  { %v840_v13 = vsel %vm212_vm2, %v815_v12, -inf }
 0x3d1   :  { %841 = vmax.xlane.f32.xlu1 %v840_v13  ;;  %v2036_v15 = vpop.f32.mrf.mxu1  ;;  %838 = vmax.xlane.f32.xlu0 %v837_v14 }
 0x3e2   :  { %983 = vrot.lane.b32.xlu1 %v2354_v41, %s2248_s27 }
 0x3e4   :  { %v821_v16 = vpop.xlane.xlu0 %820 }
 0x3e5   :  { %v843_v17 = vsub.f32 %v283_v54, %v821_v16 }
 0x3e6   :  { %1059 = vrot.lane.b32.xlu1 %v2352_v40, %s2248_s27 }
 0x3e7   :  { %907 = vrot.lane.b32.xlu0 %v2341_v38, %s2248_s27  ;;  %v851_v18 = vmul.f32 1.442695, %v843_v17 }
 0x3e9   :  { %2136 = vpow2.f32 %v851_v18 }
 0x3ea   :  { %1135 = vrot.lane.b32.xlu1 %v2358_v42, %s2248_s27 }
 0x3eb   :  { %1211 = vrot.lane.b32.xlu0 %v2345_v39, %s2248_s27 }
 0x3ee   :  { %1287 = vrot.lane.b32.xlu1 %v2364_v44, %s2248_s27 }
 0x3f6   :  { %v2439_v19 = vpop.eup %2136 }
 0x3f7   :  { %v867_v20 = vsel %vm212_vm2, %v2439_v19, 0.0 }
 0x40a   :  { %868 = vadd.xlane.f32.xlu0 %v867_v20 }
 0x44e   :  { %v824_v21 = vpop.xlane.xlu1 %823  ;;  %v827_v22 = vpop.xlane.xlu0 %826 }
 0x44f   :  { %v844_v23 = vsub.f32 %v359_v57, %v824_v21  ;;  %v845_v24 = vsub.f32 %v435_v58, %v827_v22 }
 0x451   :  { %v853_v25 = vmul.f32 1.442695, %v844_v23  ;;  %v855_v26 = vmul.f32 1.442695, %v845_v24 }
 0x452   :  { %v830_v27 = vpop.xlane.xlu0 %829 }
 0x453   :  { %2138 = vpow2.f32 %v853_v25  ;;  %v846_v28 = vsub.f32 %v511_v63, %v830_v27 }
 0x454   :  { %2140 = vpow2.f32 %v855_v26 }
 0x455   :  { %v857_v29 = vmul.f32 1.442695, %v846_v28 }
 0x456   :  { %v836_v30 = vpop.xlane.xlu1 %835  ;;  %v833_v31 = vpop.xlane.xlu0 %832 }
 0x457   :  { %2142 = vpow2.f32 %v857_v29  ;;  %v848_v32 = vsub.f32 %v663_v6, %v836_v30  ;;  %v847_v33 = vsub.f32 %v587_v2, %v833_v31  ;;  %v1550_v29 = vld [vmem:[%s2575_s3 + $0x18] sm:$0xff]  ;;  %v1549_v30 = vld [vmem:[%s2575_s3 + $0x10] sm:$0xff] }
 0x459   :  { %v861_v35 = vmul.f32 1.442695, %v848_v32  ;;  %v859_v36 = vmul.f32 1.442695, %v847_v33  ;;  %v1547_v33 = vld [vmem:[%s2575_s3] sm:$0xff] }
 0x45a   :  { %v842_v37 = vpop.xlane.xlu1 %841  ;;  %v839_v38 = vpop.xlane.xlu0 %838 }
 0x45b   :  { %2144 = vpow2.f32 %v861_v35  ;;  %v850_v39 = vsub.f32 %v815_v12, %v842_v37  ;;  %v849_v40 = vsub.f32 %v739_v7, %v839_v38 }
 0x45c   :  { %2146 = vpow2.f32 %v859_v36 }
 0x45d   :  { %v865_v41 = vmul.f32 1.442695, %v850_v39  ;;  %v863_v42 = vmul.f32 1.442695, %v849_v40 }
 0x45e   :  { %v984_v44 = vpop.permute.xlu1 %983  ;;  %v908_v45 = vpop.permute.xlu0 %907 }
 0x45f   :  { %2148 = vpow2.f32 %v865_v41  ;;  %2038 = vmatpush3.msra.mxu0 %v908_v45  ;;  %2043 = vmatpush3.msra.mxu1 %v984_v44 }
 0x460   :  { %v2139_v47 = vpop.eup %2138  ;;  %2150 = vpow2.f32 %v863_v42  ;;  %2047 = vmatprep.subr.mxu0 %v2242_v34  ;;  %2052 = vmatprep.subr.mxu1 %v2242_v34 }
 0x461   :  { %v2141_v48 = vpop.eup %2140  ;;  %v870_v49 = vsel %vm212_vm2, %v2139_v47, 0.0 }
 0x462   :  { %871 = vadd.xlane.f32.xlu1 %v870_v49  ;;  %v873_v50 = vsel %vm212_vm2, %v2141_v48, 0.0  ;;  %v1212_v61 = vpop.permute.xlu0 %1211  ;;  %v1060_v3 = vpop.permute.xlu1 %1059 }
 0x463   :  { %874 = vadd.xlane.f32.xlu0 %v873_v50 }
 0x464   :  { %v2143_v51 = vpop.eup %2142 }
 0x465   :  { %v876_v52 = vsel %vm212_vm2, %v2143_v51, 0.0 }
 0x466   :  { %877 = vadd.xlane.f32.xlu1 %v876_v52  ;;  %v1136_v4 = vpop.permute.xlu1 %1135 }
 0x468   :  { %v2145_v53 = vpop.eup %2144 }
 0x469   :  { %v2147_v54 = vpop.eup %2146  ;;  %v882_v55 = vsel %vm212_vm2, %v2145_v53, 0.0 }
 0x46a   :  { %883 = vadd.xlane.f32.xlu1 %v882_v55  ;;  %v879_v56 = vsel %vm212_vm2, %v2147_v54, 0.0 }
 0x46b   :  { %880 = vadd.xlane.f32.xlu0 %v879_v56 }
 0x46c   :  { %v2450_v57 = vpop.eup %2148 }
 0x46d   :  { %v2452_v58 = vpop.eup %2150  ;;  %v888_v59 = vsel %vm212_vm2, %v2450_v57, 0.0 }
 0x46e   :  { %889 = vadd.xlane.f32.xlu1 %v888_v59  ;;  %v885_v60 = vsel %vm212_vm2, %v2452_v58, 0.0 }
 0x46f   :  { %886 = vadd.xlane.f32.xlu0 %v885_v60 }
 0x47f   :  { %1439 = vrot.lane.b32.xlu1 %v2370_v46, %s2248_s27  ;;  %v1288_v46 = vpop.permute.xlu1 %1287 }
 0x485   :  { %1363 = vrot.lane.b32.xlu0 %v2360_v43, %s2248_s27 }
 0x493   :  { %v869_v62 = vpop.xlane.xlu0 %868 }
 0x494   :  { %2152 = vrcp.f32 %v869_v62 }
 0x4a1   :  { %v2153_v63 = vpop.eup %2152 }
 0x4a2   :  { %v892_v2 = vmul.f32 %v2153_v63, %v2439_v19 }
 0x4a4   :  { %2040 = vmatmul.mubr.msk.f32.vlgmr.msra.gmra.mxu0 %vm212_vm2, %v892_v2 }
 0x4a5   :  { %2048 = vmatpush3.msra.mxu0 %v1060_v3  ;;  %2049 = vmatprep.mubr.msk.f32.mxu0 %vm2243_vm1, %v2242_v34 }
 0x4a6   :  { %2057 = vmatprep.subr.mxu0 %v2242_v34 }
 0x4eb   :  { %v872_v5 = vpop.xlane.xlu1 %871 }
 0x4ec   :  { %2154 = vrcp.f32 %v872_v5  ;;  %v875_v43 = vpop.xlane.xlu0 %874 }
 0x4ed   :  { %2156 = vrcp.f32 %v875_v43 }
 0x4ef   :  { %v878_v6 = vpop.xlane.xlu1 %877 }
 0x4f0   :  { %2158 = vrcp.f32 %v878_v6 }
 0x4f3   :  { %v884_v7 = vpop.xlane.xlu1 %883 }
 0x4f4   :  { %2160 = vrcp.f32 %v884_v7  ;;  %v881_v8 = vpop.xlane.xlu0 %880 }
 0x4f5   :  { %2162 = vrcp.f32 %v881_v8 }
 0x4f7   :  { %v890_v9 = vpop.xlane.xlu1 %889 }
 0x4f8   :  { %2164 = vrcp.f32 %v890_v9  ;;  %v887_v10 = vpop.xlane.xlu0 %886 }
 0x4f9   :  { %v2155_v11 = vpop.eup %2154  ;;  %2166 = vrcp.f32 %v887_v10 }
 0x4fa   :  { %v2157_v12 = vpop.eup %2156  ;;  %v894_v13 = vmul.f32 %v2155_v11, %v2139_v47 }
 0x4fb   :  { %v896_v14 = vmul.f32 %v2157_v12, %v2141_v48  ;;  %v1440_v21 = vpop.permute.xlu1 %1439 }
 0x4fc   :  { %2045 = vmatmul.mubr.msk.f32.vlgmr.msra.gmra.mxu1 %vm212_vm2, %v894_v13  ;;  %v1364_v23 = vpop.permute.xlu0 %1363 }
 0x4fd   :  { %v2159_v15 = vpop.eup %2158  ;;  %2050 = vmatmul.mubr.msk.f32.vlgmr.msra.gmra.mxu0 %vm212_vm2, %v896_v14  ;;  %2053 = vmatpush3.msra.mxu1 %v1136_v4  ;;  %v1679_v14 = vld [vmem:[%s2577_s5 + $0x18] sm:$0xff] }
 0x4fe   :  { %2058 = vmatpush3.msra.mxu0 %v1212_v61  ;;  %2054 = vmatprep.mubr.msk.f32.mxu1 %vm2243_vm1, %v2242_v34  ;;  %v898_v16 = vmul.f32 %v2159_v15, %v2143_v51  ;;  %v1915_v61 = vld [vmem:[#allocation5] ss:$0 sm:$0xff] }
 0x4ff   :  { %2062 = vmatprep.subr.mxu1 %v2242_v34  ;;  %2059 = vmatprep.mubr.msk.f32.mxu0 %vm2243_vm1, %v2242_v34  ;;  %v1678_v15 = vld [vmem:[%s2577_s5 + $0x10] sm:$0xff] }
 0x500   :  { %2055 = vmatmul.mubr.msk.f32.vlgmr.msra.gmra.mxu1 %vm212_vm2, %v898_v16  ;;  %2067 = vmatprep.subr.mxu0 %v2242_v34  ;;  %v1677_v16 = vld [vmem:[%s2577_s5 + $0x8] sm:$0xff] }
 0x501   :  { %v2161_v17 = vpop.eup %2160  ;;  %2063 = vmatpush3.msra.mxu1 %v1288_v46  ;;  %2064 = vmatprep.mubr.msk.f32.mxu1 %vm2243_vm1, %v2242_v34 }
 0x502   :  { %v2163_v18 = vpop.eup %2162  ;;  %2072 = vmatprep.subr.mxu1 %v2242_v34  ;;  %v902_v19 = vmul.f32 %v2161_v17, %v2145_v53  ;;  %v1676_v17 = vld [vmem:[%s2577_s5] sm:$0xff] }
 0x503   :  { %v900_v20 = vmul.f32 %v2163_v18, %v2147_v54  ;;  %v1777_v18 = vld [vmem:[%s2579_s7 + $0x38] sm:$0xff] }
 0x504   :  { %2065 = vmatmul.mubr.msk.f32.vlgmr.msra.gmra.mxu1 %vm212_vm2, %v902_v19  ;;  %v1776_v19 = vld [vmem:[%s2579_s7 + $0x30] sm:$0xff] }
 0x505   :  { %v2165_v22 = vpop.eup %2164  ;;  %2060 = vmatmul.mubr.msk.f32.vlgmr.msra.gmra.mxu0 %vm212_vm2, %v900_v20  ;;  %2073 = vmatpush3.msra.mxu1 %v1440_v21  ;;  %v1775_v20 = vld [vmem:[%s2579_s7 + $0x28] sm:$0xff]  ;;  %v1774_v21 = vld [vmem:[%s2579_s7 + $0x20] sm:$0xff] }
 0x506   :  { %v2167_v24 = vpop.eup %2166  ;;  %2068 = vmatpush3.msra.mxu0 %v1364_v23  ;;  %2069 = vmatprep.mubr.msk.f32.mxu0 %vm2243_vm1, %v2242_v34  ;;  %v906_v25 = vmul.f32 %v2165_v22, %v2450_v57 }
 0x507   :  { %2074 = vmatprep.mubr.msk.f32.mxu1 %vm2243_vm1, %v2242_v34  ;;  %v904_v26 = vmul.f32 %v2167_v24, %v2452_v58  ;;  %2077 = vmatprep.subr.mxu0 %v1550_v29  ;;  %v1548_v34 = vld [vmem:[%s2575_s3 + $0x8] sm:$0xff] }
 0x508   :  { %2075 = vmatmul.mubr.msk.f32.vlgmr.msra.gmra.mxu1 %vm212_vm2, %v906_v25  ;;  %2088 = vmatprep.subr.mxu1 %v1679_v14 }
 0x509   :  { %2070 = vmatmul.mubr.msk.f32.vlgmr.msra.gmra.mxu0 %vm212_vm2, %v904_v26  ;;  %2089 = vmatpush3.msra.mxu1 %v1679_v14 }
 0x50a   :  { %2078 = vmatpush3.msra.mxu0 %v1550_v29  ;;  %2090 = vmatprep.subr.mxu1 %v1678_v15  ;;  %v1918_v29 = vld [vmem:[#allocation5 + $0x3] ss:$0 sm:$0xff] }
 0x50b   :  { %2079 = vmatprep.subr.mxu0 %v1549_v30  ;;  %2091 = vmatpush3.msra.mxu1 %v1678_v15 }
 0x50c   :  { %2080 = vmatpush3.msra.mxu0 %v1549_v30  ;;  %2092 = vmatprep.subr.mxu1 %v1677_v16 }
 0x50d   :  { %2081 = vmatprep.subr.mxu0 %v1548_v34  ;;  %2093 = vmatpush3.msra.mxu1 %v1677_v16 }
 0x50e   :  { %2082 = vmatpush3.msra.mxu0 %v1548_v34  ;;  %2094 = vmatprep.subr.mxu1 %v1676_v17  ;;  %v1919_v34 = vld [vmem:[#allocation5 + $0x4] ss:$0 sm:$0xff] }
 0x50f   :  { %2083 = vmatprep.subr.mxu0 %v1547_v33  ;;  %2095 = vmatpush3.msra.mxu1 %v1676_v17 }
 0x510   :  { %2084 = vmatpush3.msra.mxu0 %v1547_v33 }
 0x511   :  { %2099 = vmatprep.subr.mxu0 %v1777_v18 }
 0x564   :  { %v979_v27 = vpop.f32.mrf.mxu0 }
 0x566   :  { %v2041_v28 = vpop.f32.mrf.mxu0 }
 0x5bc   :  { %v1055_v31 = vpop.f32.mrf.mxu1 }
 0x5bd   :  { %v1131_v32 = vpop.f32.mrf.mxu0  ;;  %1516 = vrot.lane.b32.xlu0 %v1055_v31, %s2240_s9 }
 0x5be   :  { %1520 = vrot.lane.b32.xlu1 %v1131_v32, %s2249_s16  ;;  %v2046_v35 = vpop.f32.mrf.mxu1 }
 0x5bf   :  { %v2051_v36 = vpop.f32.mrf.mxu0 }
 0x5c0   :  { %v1207_v37 = vpop.f32.mrf.mxu1 }
 0x5c2   :  { %1524 = vrot.lane.b32.xlu1 %v1207_v37, %s2250_s0  ;;  %v2056_v38 = vpop.f32.mrf.mxu1 }
 0x5c3   :  { %v1773_v38 = vld [vmem:[%s2579_s7 + $0x18] sm:$0xff] }
 0x5c4   :  { %v1359_v39 = vpop.f32.mrf.mxu1 }
 0x5c5   :  { %v1283_v40 = vpop.f32.mrf.mxu0  ;;  %1533 = vrot.lane.b32.xlu0 %v1359_v39, %s2240_s9  ;;  %v1772_v39 = vld [vmem:[%s2579_s7 + $0x10] sm:$0xff] }
 0x5c6   :  { %v2066_v41 = vpop.f32.mrf.mxu1 }
 0x5c7   :  { %v2061_v42 = vpop.f32.mrf.mxu0  ;;  %v1770_v41 = vld [vmem:[%s2579_s7] sm:$0xff] }
 0x5c8   :  { %v1511_v44 = vpop.f32.mrf.mxu1  ;;  %v1920_v42 = vld [vmem:[%s2578_s6] ss:$0 sm:$0xff] }
 0x5c9   :  { %v1435_v45 = vpop.f32.mrf.mxu0  ;;  %1541 = vrot.lane.b32.xlu1 %v1511_v44, %s2250_s0 }
 0x5ca   :  { %1537 = vrot.lane.b32.xlu0 %v1435_v45, %s2249_s16  ;;  %v2076_v47 = vpop.f32.mrf.mxu1 }
 0x5cb   :  { %v2071_v48 = vpop.f32.mrf.mxu0 }
 0x62f   :  { %v1517_v49 = vpop.permute.xlu0 %1516 }
 0x630   :  { %v1521_v50 = vpop.permute.xlu1 %1520  ;;  %v1527_v51 = vsel %vm212_vm2, %v979_v27, %v1517_v49 }
 0x631   :  { %v1529_v53 = vsel %vm1528_vm3, %v1527_v51, %v1521_v50  ;;  %v1923_v51 = vld [vmem:[#allocation5 + $0x5] ss:$0 sm:$0xff] }
 0x634   :  { %v1525_v52 = vpop.permute.xlu1 %1524 }
 0x635   :  { %v1531_v54 = vsel %vm1530_vm4, %v1529_v53, %v1525_v52 }
 0x636   :  { %2085 = vmatprep.mubr.msk.f32.mxu0 %vm64_vm0, %v1531_v54 }
 0x637   :  { %v1534_v55 = vpop.permute.xlu0 %1533 }
 0x638   :  { %v1544_v57 = vsel %vm212_vm2, %v1283_v40, %v1534_v55  ;;  %v1771_v40 = vld [vmem:[%s2579_s7 + $0x8] sm:$0xff]  ;;  %s2251_s7 = smov [#allocation7]  }
 0x639   :  { %s1873_s3 = sshll.u32 %s2251_s7, 4  ;;  %s1874_s3 = int_to_ptr.vmem [resolvable:$true] %s1873_s3 }
 0x63a   :  { %s2212_s6 = scalar_lea.vmem %s1874_s3, 256  ;;  %p2217_p11 = scmp.lt.s32.totalorder %s1874_s3, %s1874_s3 }
 0x63b   :  { %v1542_v56 = vpop.permute.xlu1 %1541  ;;  %p2213_p10 = scmp.ne.s32.totalorder %s1874_s3, %s2212_s6  ;;  %p2218_p12 = scmp.lt.s32.totalorder %s2212_s6, %s2212_s6 }
 0x63c   :  { %v1538_v58 = vpop.permute.xlu0 %1537 }
 0x63d   :  { %v1545_v59 = vsel %vm1528_vm3, %v1544_v57, %v1538_v58  ;;  %p2219_p13 = por %p2218_p12, %p2217_p11 }
 0x63e   :  { %v1546_v60 = vsel %vm1530_vm4, %v1545_v59, %v1542_v56 }
 0x63f   :  { %2086 = vmatmul.mubr.msk.f32.vlgmr.msra.gmra.mxu0 %vm64_vm0, %v1546_v60  ;;  %p2220_p0 = pnand %p2219_p13, %p2213_p10 }
 0x640   :  { %2100 = vmatpush3.msra.mxu0 %v1777_v18 }
 0x641   :  { %2101 = vmatprep.subr.mxu0 %v1776_v19 }
 0x642   :  { %2102 = vmatpush3.msra.mxu0 %v1776_v19 }
 0x643   :  { %2103 = vmatprep.subr.mxu0 %v1775_v20 }
 0x644   :  { %2104 = vmatpush3.msra.mxu0 %v1775_v20 }
 0x645   :  { %2105 = vmatprep.subr.mxu0 %v1774_v21 }
 0x646   :  { %2106 = vmatpush3.msra.mxu0 %v1774_v21 }
 0x647   :  { %2107 = vmatprep.subr.mxu0 %v1773_v38 }
 0x648   :  { %2108 = vmatpush3.msra.mxu0 %v1773_v38 }
 0x649   :  { %2109 = vmatprep.subr.mxu0 %v1772_v39 }
 0x64a   :  { %2110 = vmatpush3.msra.mxu0 %v1772_v39 }
 0x64b   :  { %2111 = vmatprep.subr.mxu0 %v1771_v40 }
 0x64c   :  { %2112 = vmatpush3.msra.mxu0 %v1771_v40 }
 0x64d   :  { %2113 = vmatprep.subr.mxu0 %v1770_v41 }
 0x64e   :  { %2114 = vmatpush3.msra.mxu0 %v1770_v41 }
 0x6ff   :  { %v2087_v62 = vpop.f32.mrf.mxu0 }
 0x700   :  { %v1633_v63 = vadd.f32 %v2087_v62, %v1915_v61 }
 0x701   :  { %v1627_v2 = vpop.f32.mrf.mxu0 }
 0x702   :  { %v2508_v3 = vadd.f32 %v1633_v63, %v2308_v1  ;;  %v1628_v4 = vadd.f32 %v1915_v61, %v1627_v2 }
 0x704   :  { %v2511_v46 = vadd.f32 %v1628_v4, %v2306_v0  ;;  %v1641_v5 = vsel %vm64_vm0, %v2508_v3, 0.0 }
 0x705   :  { %1642 = vadd.xlane.f32.xlu1 %v1641_v5 }
 0x706   :  { %v1638_v43 = vsel %vm64_vm0, %v2511_v46, 0.0 }
 0x707   :  { %1639 = vadd.xlane.f32.xlu0 %v1638_v43 }
 0x78e   :  { %v1643_v6 = vpop.xlane.xlu1 %1642 }
 0x78f   :  { %v1645_v7 = vmul.f32 0.03125, %v1643_v6 }
 0x790   :  { %v1640_v8 = vpop.xlane.xlu0 %1639 }
 0x791   :  { %v1644_v9 = vmul.f32 0.03125, %v1640_v8  ;;  %v1647_v10 = vsub.f32 %v2508_v3, %v1645_v7 }
 0x793   :  { %v1646_v1 = vsub.f32 %v2511_v46, %v1644_v9  ;;  %v1649_v12 = vmul.f32 %v1647_v10, %v1647_v10 }
 0x795   :  { %v1648_v11 = vmul.f32 %v1646_v1, %v1646_v1  ;;  %v1653_v13 = vsel %vm64_vm0, %v1649_v12, 0.0 }
 0x797   :  { %v1650_v0 = vsel %vm64_vm0, %v1648_v11, 0.0 }
 0x798   :  { %1651 = vadd.xlane.f32.xlu0 %v1650_v0 }
 0x79c   :  { %1654 = vadd.xlane.f32.xlu0 %v1653_v13 }
 0x821   :  { %v1652_v22 = vpop.xlane.xlu0 %1651 }
 0x822   :  { %v1656_v23 = vmul.f32 0.03125, %v1652_v22 }
 0x824   :  { %v1658_v24 = vadd.f32 1e-05, %v1656_v23 }
 0x825   :  { %v1655_v25 = vpop.xlane.xlu0 %1654 }
 0x826   :  { %2168 = vrsqrt.f32 %v1658_v24  ;;  %v1657_v26 = vmul.f32 0.03125, %v1655_v25 }
 0x828   :  { %v1659_v27 = vadd.f32 1e-05, %v1657_v26 }
 0x82a   :  { %2170 = vrsqrt.f32 %v1659_v27 }
 0x833   :  { %v2169_v28 = vpop.eup %2168 }
 0x834   :  { %v1662_v30 = vmul.f32 %v2169_v28, %v1646_v1 }
 0x836   :  { %v1668_v31 = vmul.f32 %v1918_v29, %v1662_v30 }
 0x837   :  { %v2171_v32 = vpop.eup %2170 }
 0x838   :  { %v1663_v33 = vmul.f32 %v2171_v32, %v1647_v10  ;;  %v1674_v35 = vadd.f32 %v1919_v34, %v1668_v31 }
 0x83a   :  { %v1669_v36 = vmul.f32 %v1918_v29, %v1663_v33  ;;  %2096 = vmatprep.mubr.msk.f32.mxu1 %vm64_vm0, %v1674_v35 }
 0x83c   :  { %v1675_v37 = vadd.f32 %v1919_v34, %v1669_v36 }
 0x83e   :  { %2097 = vmatmul.mubr.msk.f32.vlgmr.msra.gmra.mxu1 %vm64_vm0, %v1675_v37 }
 0x8fe   :  { %v2098_v44 = vpop.f32.mrf.mxu1 }
 0x8ff   :  { %v1765_v45 = vadd.f32 %v2098_v44, %v1920_v42 }
 0x900   :  { %v1759_v47 = vpop.f32.mrf.mxu1 }
 0x901   :  { %v1760_v48 = vadd.f32 %v1920_v42, %v1759_v47  ;;  %v1769_v50 = vmax.f32 %v1765_v45, 0.0 }
 0x903   :  { %v1768_v49 = vmax.f32 %v1760_v48, 0.0 }
 0x905   :  { %2115 = vmatprep.mubr.msk.f32.mxu0 %vm1782_vm5, %v1768_v49 }
 0x906   :  { %2116 = vmatmul.mubr.msk.f32.vlgmr.msra.gmra.mxu0 %vm1782_vm5, %v1769_v50 }
 0x9c6   :  { %v2117_v52 = vpop.f32.mrf.mxu0 }
 0x9c7   :  { %v1861_v53 = vadd.f32 %v2117_v52, %v1923_v51 }
 0x9c8   :  { %v1855_v54 = vpop.f32.mrf.mxu0 }
 0x9c9   :  { %v1865_v55 = vadd.f32 %v1861_v53, %v2508_v3  ;;  %v1856_v56 = vadd.f32 %v1923_v51, %v1855_v54 }
 0x9cb   :  { %1867 = vst.msk [vmem:[#allocation7 + $0x8] sm:$0xff] %vm64_vm0, %v1865_v55  ;;  %v1864_v57 = vadd.f32 %v1856_v56, %v2511_v46 }
 0x9cd   :  { %1866 = vst.msk [vmem:[#allocation7] sm:$0xff] %vm64_vm0, %v1864_v57 }
 0x9ce   :  { %2223 = shalt.err (!%p2220_p0)
}
 0x9cf   :  { %1879 = dma.vmem_to_hbm [thread:$0]  %s1874_s3, 256, %s2580_s8, [#allocation4], %s2239_s30, %s2239_s30, %s2240_s9  }
 0x9d0   :  { %2236 = dma.done.wait [#allocation4], 256  }
 0x9d1   :  { %2237 = vsyncadd [#allocation4], 4294967040 }
 0x9d2   :  { %1883 = vsyncpa [#allocation3], 1 }
 0x9d3   :  { %1884 = vsyncpa [#allocation6], 1 }
 0x9d4   :  { %1885 = vsyncpa [#allocation4], 1 }

</bundles_post_ra>
